<compile_context>
chip_gen: v7x
topology: tpu7x:2x2x1
jax: 0.10.0
libtpu: 0.0.40
codegen_flags: <defaults>
</compile_context>

<pallas_src>
import functools

import jax
import jax.numpy as jnp
from jax.experimental import pallas as pl
from jax.experimental.pallas import tpu as pltpu


def _mae_loss_kernel(pred_ref, target_ref, mask_ref, out_ref, *,
                     norm_pix_loss: bool, total_rows: int, tile_rows: int):
    p = pred_ref[...].astype(jnp.float32)            # (T, D)
    t = target_ref[...].astype(jnp.float32)          # (T, D)
    m = mask_ref[...].astype(jnp.float32)            # (T, 1)
    d = p.shape[-1]
    inv_d = jnp.float32(1.0 / d)

    if norm_pix_loss:
        # torch.var default is unbiased (ddof = 1)
        inv_dm1 = jnp.float32(1.0 / max(d - 1, 1))
        mean = jnp.sum(t, axis=-1, keepdims=True) * inv_d
        tc = t - mean
        var = jnp.sum(tc * tc, axis=-1, keepdims=True) * inv_dm1
        t = tc * jax.lax.rsqrt(var + jnp.float32(1e-6))   # rsqrt -> EUP

    diff = p - t
    row_loss = jnp.sum(diff * diff, axis=-1, keepdims=True) * inv_d   # (T, 1)

    # Row-validity predicate for the ragged last block.  OOB rows of the block
    # hold uninitialized data (possibly NaN/Inf), so select (where), never
    # rely on multiply-by-zero.
    row0 = pl.program_id(0) * tile_rows
    rid = row0 + jax.lax.broadcasted_iota(jnp.int32, row_loss.shape, 0)
    valid = rid < total_rows
    row_loss = jnp.where(valid, row_loss, jnp.float32(0.0))
    m = jnp.where(valid, m, jnp.float32(0.0))

    loss_part = jnp.sum(row_loss * m)    # scalar partial (numerator)
    mask_part = jnp.sum(m)               # scalar partial (denominator)

    # Lane-dense partials row: lane 0 = masked loss sum, lane 1 = mask sum.
    lane = jax.lax.broadcasted_iota(jnp.int32, out_ref.shape, 2)
    out_ref[...] = jnp.where(lane == 0, loss_part,
                             jnp.where(lane == 1, mask_part, jnp.float32(0.0)))


def _sublane_multiple(dtype) -> int:
    itemsize = jnp.dtype(dtype).itemsize
    return max(8, 8 * (4 // max(itemsize, 1)))   # 8 f32, 16 bf16, 32 int8/fp8


def _round_up(x: int, m: int) -> int:
    return ((x + m - 1) // m) * m


def _cdiv(a: int, b: int) -> int:
    return (a + b - 1) // b


def _vmem_capacity_bytes() -> int:
    try:
        cap = int(pltpu.get_tpu_info().vmem_capacity_bytes)
        if cap > 0:
            return cap
    except Exception:
        pass
    return 64 * 1024 * 1024            # conservative floor (v7x per TensorCore)


def _pick_tile_rows(R: int, D: int, in_itemsize: int, quant: int,
                    budget_bytes: int) -> int:
    per_row = 2 * 2 * D * in_itemsize   # double-buffered pred+target tiles
    per_row += 4 * D * 4                # in-kernel f32 temps (t, tc, diff, sq)
    per_row += 2 * 128 * 4              # lane-padded (T,1) mask, double-buffered
    t = max(quant, budget_bytes // per_row)
    return int((t // quant) * quant)


def mae_loss(pred, target, mask, *, norm_pix_loss=True, tile_rows=None):
    N, L, D = pred.shape
    R = N * L
    in_itemsize = jnp.dtype(pred.dtype).itemsize
    quant = _sublane_multiple(pred.dtype)

    vmem_cap = _vmem_capacity_bytes()
    budget = max((vmem_cap * 3) // 8, 8 << 20)          # input-tile budget
    vmem_limit = min(max((vmem_cap * 3) // 4, 32 << 20), 128 << 20)

    if tile_rows is None:
        tile_rows = _pick_tile_rows(R, D, in_itemsize, quant, budget)
        tile_rows = min(tile_rows, _round_up(R, quant))
        if R > quant:   # >= 2 blocks so v7x's two TensorCores both get work
            tile_rows = min(tile_rows, _round_up(_cdiv(R, 2), quant))
        tile_rows = max(tile_rows, quant)
    else:
        tile_rows = max(quant, (int(tile_rows) // quant) * quant)

    num_blocks = _cdiv(R, tile_rows)

    pred2 = pred.reshape(R, D)
    target2 = target.reshape(R, D)
    mask2 = mask.reshape(R, 1).astype(jnp.float32)

    kernel = functools.partial(_mae_loss_kernel, norm_pix_loss=norm_pix_loss,
                               total_rows=R, tile_rows=tile_rows)

    partials = pl.pallas_call(
        kernel,
        out_shape=jax.ShapeDtypeStruct((num_blocks, 1, 128), jnp.float32),
        grid_spec=pltpu.PrefetchScalarGridSpec(
            num_scalar_prefetch=0,
            grid=(num_blocks,),
            in_specs=[
                pl.BlockSpec((tile_rows, D), lambda i: (i, 0)),
                pl.BlockSpec((tile_rows, D), lambda i: (i, 0)),
                pl.BlockSpec((tile_rows, 1), lambda i: (i, 0)),
            ],
            out_specs=pl.BlockSpec((1, 1, 128), lambda i: (i, 0, 0)),
        ),
        compiler_params=pltpu.CompilerParams(
            dimension_semantics=("parallel",),
            vmem_limit_bytes=int(vmem_limit),
        ),
    )(pred2, target2, mask2)

    loss_sum = jnp.sum(partials[:, 0, 0])
    mask_sum = jnp.sum(partials[:, 0, 1])
    # Note: mask.sum() == 0 yields NaN, matching the PyTorch reference.
    return loss_sum / mask_sum


def mae_loss_ref(pred, target, mask, norm_pix_loss=True):
    pred = pred.astype(jnp.float32)
    target = target.astype(jnp.float32)
    mask = mask.astype(jnp.float32)
    if norm_pix_loss:
        mean = target.mean(axis=-1, keepdims=True)
        var = jnp.var(target, axis=-1, keepdims=True, ddof=1)
        target = (target - mean) / (var + 1e-6) ** 0.5
    loss = (pred - target) ** 2
    loss = loss.mean(axis=-1)
    return (loss * mask).sum() / mask.sum()


if __name__ == "__main__":
    key = jax.random.PRNGKey(0)
    kp, kt, km = jax.random.split(key, 3)

    # Primary check: f32, auto tile sizing (2 parallel blocks, exact split).
    N, L, D = 2, 8, 128   # batch, patches, patch_dim
    pred = jax.random.normal(kp, (N, L, D), dtype=jnp.float32)
    target = jax.random.normal(kt, (N, L, D), dtype=jnp.float32)
    mask = (jax.random.uniform(km, (N, L)) > 0.5).astype(jnp.float32)
    mask = mask.at[0, 0].set(1.0)   # guarantee non-empty mask

    out = mae_loss(pred, target, mask, norm_pix_loss=True)
    out = jax.block_until_ready(out)
    ref = mae_loss_ref(pred, target, mask, norm_pix_loss=True)
    assert jnp.allclose(out, ref, rtol=1e-5, atol=1e-5), (out, ref)

    # Secondary check: R not divisible by tile_rows -> exercises the in-kernel
    # ragged-tail masking (no wrapper-side padding of pred/target).
    N2, L2 = 2, 10
    pred_b = jax.random.normal(kp, (N2, L2, D), dtype=jnp.float32)
    target_b = jax.random.normal(kt, (N2, L2, D), dtype=jnp.float32)
    mask_b = (jax.random.uniform(km, (N2, L2)) > 0.5).astype(jnp.float32)
    mask_b = mask_b.at[0, 0].set(1.0)

    out_b = mae_loss(pred_b, target_b, mask_b, norm_pix_loss=True, tile_rows=16)
    out_b = jax.block_until_ready(out_b)
    ref_b = mae_loss_ref(pred_b, target_b, mask_b, norm_pix_loss=True)
    assert jnp.allclose(out_b, ref_b, rtol=1e-5, atol=1e-5), (out_b, ref_b)

    print("KERNEL_OK")
</pallas_src>

<mosaic_0001>
module attributes {stable_mosaic.version = 11 : i64} {
  func.func @_mae_loss_kernel(%arg0: i32, %arg1: memref<8x128xf32, #tpu.memory_space<vmem>>, %arg2: memref<8x128xf32, #tpu.memory_space<vmem>>, %arg3: memref<8x1xf32, #tpu.memory_space<vmem>>, %arg4: memref<1x1x128xf32, #tpu.memory_space<vmem>>) attributes {dimension_semantics = [#tpu.dimension_semantics<parallel>], iteration_bounds = array<i64: 2>, scalar_prefetch = 0 : i64, scratch_operands = 0 : i64, tpu.core_type = #tpu.core_type<tc>, window_params = [{transform_indices = @transform_0, window_bounds = array<i64: 8, 128>}, {transform_indices = @transform_1, window_bounds = array<i64: 8, 128>}, {transform_indices = @transform_2, window_bounds = array<i64: 8, 1>}, {transform_indices = @transform_3, window_bounds = array<i64: 1, 1, 128>}]} {
    %c0 = arith.constant 0 : index
    %c0_0 = arith.constant 0 : index
    %0 = vector.load %arg1[%c0, %c0_0] : memref<8x128xf32, #tpu.memory_space<vmem>>, vector<8x128xf32>
    %c0_1 = arith.constant 0 : index
    %c0_2 = arith.constant 0 : index
    %1 = vector.load %arg2[%c0_1, %c0_2] : memref<8x128xf32, #tpu.memory_space<vmem>>, vector<8x128xf32>
    %c0_3 = arith.constant 0 : index
    %c0_4 = arith.constant 0 : index
    %2 = vector.load %arg3[%c0_3, %c0_4] : memref<8x1xf32, #tpu.memory_space<vmem>>, vector<8x1xf32>
    %cst = arith.constant dense<0.000000e+00> : vector<8xf32>
    %3 = vector.multi_reduction <add>, %1, %cst [1] : vector<8x128xf32> to vector<8xf32>
    %4 = vector.shape_cast %3 : vector<8xf32> to vector<8x1xf32>
    %cst_5 = arith.constant 7.812500e-03 : f32
    %5 = vector.broadcast %cst_5 : f32 to vector<8x1xf32>
    %6 = arith.mulf %4, %5 : vector<8x1xf32>
    %7 = vector.broadcast %6 : vector<8x1xf32> to vector<8x128xf32>
    %8 = arith.subf %1, %7 : vector<8x128xf32>
    %9 = arith.mulf %8, %8 : vector<8x128xf32>
    %cst_6 = arith.constant dense<0.000000e+00> : vector<8xf32>
    %10 = vector.multi_reduction <add>, %9, %cst_6 [1] : vector<8x128xf32> to vector<8xf32>
    %11 = vector.shape_cast %10 : vector<8xf32> to vector<8x1xf32>
    %cst_7 = arith.constant 0.00787401571 : f32
    %12 = vector.broadcast %cst_7 : f32 to vector<8x1xf32>
    %13 = arith.mulf %11, %12 : vector<8x1xf32>
    %cst_8 = arith.constant 9.99999997E-7 : f32
    %14 = vector.broadcast %cst_8 : f32 to vector<8x1xf32>
    %15 = arith.addf %13, %14 : vector<8x1xf32>
    %16 = math.rsqrt %15 : vector<8x1xf32>
    %17 = vector.broadcast %16 : vector<8x1xf32> to vector<8x128xf32>
    %18 = arith.mulf %8, %17 : vector<8x128xf32>
    %19 = arith.subf %0, %18 : vector<8x128xf32>
    %20 = arith.mulf %19, %19 : vector<8x128xf32>
    %cst_9 = arith.constant dense<0.000000e+00> : vector<8xf32>
    %21 = vector.multi_reduction <add>, %20, %cst_9 [1] : vector<8x128xf32> to vector<8xf32>
    %22 = vector.shape_cast %21 : vector<8xf32> to vector<8x1xf32>
    %cst_10 = arith.constant 7.812500e-03 : f32
    %23 = vector.broadcast %cst_10 : f32 to vector<8x1xf32>
    %24 = arith.mulf %22, %23 : vector<8x1xf32>
    %c8_i32 = arith.constant 8 : i32
    %25 = arith.muli %arg0, %c8_i32 : i32
    %26 = tpu.iota {dimensions = array<i32: 0>} : vector<8x1xi32>
    %27 = vector.broadcast %25 : i32 to vector<8x1xi32>
    %28 = arith.addi %27, %26 : vector<8x1xi32>
    %c16_i32 = arith.constant 16 : i32
    %29 = vector.broadcast %c16_i32 : i32 to vector<8x1xi32>
    %30 = arith.cmpi slt, %28, %29 : vector<8x1xi32>
    %cst_11 = arith.constant 0.000000e+00 : f32
    %31 = vector.broadcast %cst_11 : f32 to vector<8x1xf32>
    %32 = arith.select %30, %24, %31 : vector<8x1xi1>, vector<8x1xf32>
    %cst_12 = arith.constant 0.000000e+00 : f32
    %33 = vector.broadcast %cst_12 : f32 to vector<8x1xf32>
    %34 = arith.select %30, %2, %33 : vector<8x1xi1>, vector<8x1xf32>
    %35 = arith.mulf %32, %34 : vector<8x1xf32>
    %36 = vector.shape_cast %35 : vector<8x1xf32> to vector<1x8x1xf32>
    %cst_13 = arith.constant dense<0.000000e+00> : vector<1xf32>
    %37 = vector.multi_reduction <add>, %36, %cst_13 [1, 2] : vector<1x8x1xf32> to vector<1xf32>
    %38 = vector.shape_cast %37 : vector<1xf32> to vector<1x1x1xf32>
    %39 = vector.extract %38[0, 0, 0] : f32 from vector<1x1x1xf32>
    %40 = vector.shape_cast %34 : vector<8x1xf32> to vector<1x8x1xf32>
    %cst_14 = arith.constant dense<0.000000e+00> : vector<1xf32>
    %41 = vector.multi_reduction <add>, %40, %cst_14 [1, 2] : vector<1x8x1xf32> to vector<1xf32>
    %42 = vector.shape_cast %41 : vector<1xf32> to vector<1x1x1xf32>
    %43 = vector.extract %42[0, 0, 0] : f32 from vector<1x1x1xf32>
    %44 = tpu.iota {dimensions = array<i32: 2>} : vector<1x1x128xi32>
    %c0_i32 = arith.constant 0 : i32
    %45 = vector.broadcast %c0_i32 : i32 to vector<1x1x128xi32>
    %46 = arith.cmpi eq, %44, %45 : vector<1x1x128xi32>
    %c1_i32 = arith.constant 1 : i32
    %47 = vector.broadcast %c1_i32 : i32 to vector<1x1x128xi32>
    %48 = arith.cmpi eq, %44, %47 : vector<1x1x128xi32>
    %cst_15 = arith.constant 0.000000e+00 : f32
    %49 = vector.broadcast %43 : f32 to vector<1x1x128xf32>
    %50 = vector.broadcast %cst_15 : f32 to vector<1x1x128xf32>
    %51 = arith.select %48, %49, %50 : vector<1x1x128xi1>, vector<1x1x128xf32>
    %52 = vector.broadcast %39 : f32 to vector<1x1x128xf32>
    %53 = arith.select %46, %52, %51 : vector<1x1x128xi1>, vector<1x1x128xf32>
    %c0_16 = arith.constant 0 : index
    %c0_17 = arith.constant 0 : index
    %c0_18 = arith.constant 0 : index
    %54 = vector.load %arg4[%c0_16, %c0_17, %c0_18] : memref<1x1x128xf32, #tpu.memory_space<vmem>>, vector<1x1x128xf32>
    tpu.vector_store %arg4[%c0_16, %c0_17, %c0_18], %53 {strides = array<i32>} : memref<1x1x128xf32, #tpu.memory_space<vmem>>, vector<1x1x128xf32>,
    return
  }
  func.func @transform_0(%arg0: i32) -> (i32, i32) {
    %c0_i32 = arith.constant 0 : i32
    %c0_i32_0 = arith.constant 0 : i32
    return %arg0, %c0_i32 : i32, i32
  }
  func.func @transform_1(%arg0: i32) -> (i32, i32) {
    %c0_i32 = arith.constant 0 : i32
    %c0_i32_0 = arith.constant 0 : i32
    return %arg0, %c0_i32 : i32, i32
  }
  func.func @transform_2(%arg0: i32) -> (i32, i32) {
    %c0_i32 = arith.constant 0 : i32
    %c0_i32_0 = arith.constant 0 : i32
    return %arg0, %c0_i32 : i32, i32
  }
  func.func @transform_3(%arg0: i32) -> (i32, i32, i32) {
    %c0_i32 = arith.constant 0 : i32
    %c0_i32_0 = arith.constant 0 : i32
    %c0_i32_1 = arith.constant 0 : i32
    return %arg0, %c0_i32, %c0_i32_0 : i32, i32, i32
  }
}

</mosaic_0001>

<bundles_post_ra>
// kernel: tpu_custom_call.1
= control target key start
LH: loop header
LB: loop body
LE: loop exit
PB: predicated region body
PF: predicated region fallthrough
CT: control target
= control target key end

     0   :  { %8 = vsyncpa [#allocation3], 0  ;;  %s736_s0 = inlined_call_operand.vmem [shape: f32[16,128], index: 0, kind: input, shape index: {}]   ;;  %s737_s1 = inlined_call_operand.hbm [shape: f32[16,128], index: 1, kind: input, shape index: {}]   ;;  %s738_s2 = inlined_call_operand.vmem [shape: f32[16,1], index: 2, kind: input, shape index: {}]   ;;  %s739_s3 = inlined_call_operand.hbm [shape: f32[2,1,128], index: 3, kind: output, shape index: {}]  }
   0x1   :  { %10 = vsyncpa [#allocation3 + $0x1], 0 }
   0x2   :  { %11 = vsyncpa [#allocation4], 0 }
   0x3   :  { %13 = vsyncpa [#allocation4 + $0x1], 0  ;;  %s565_s12 = smov 0   ;;  %s567_s13 = smov 0  }
   0x4   :  { %s569_s14 = smov 0   ;;  %s571_s15 = smov 0  }
   0x5 LB: > { %s586_s16 = sadd.s32 4294967295, %s541_s15   ;;  %s380_s17 = sadd.s32 4294967294, %s541_s15   ;;  %s541_s15 = sphi %s571_s15, %s754_s15   ;;  %s537_s14 = sphi %s569_s14, %s753_s14   ;;  %s533_s13 = sphi %s567_s13, %s752_s13   ;;  %s529_s12 = sphi %s565_s12, %s751_s12  }
   0x6   : > { %s590_s18 = sadd.s32 1, %s541_s15   ;;  %s52_s19 = sadd.s32 1, %s537_s14 }
   0x7   : > { %s49_s20 = ssub.s32 %s541_s15, %s590_s18  ;;  %p59_p0 = scmp.ne.s32.totalorder %s537_s14, %s533_s13 }
   0x8   : > { %p50_p1 = scmp.eq.s32.totalorder %s49_s20, 0  ;;  %p60_p2 = scmp.eq.s32.totalorder %s541_s15, 0 }
   0x9   : > { %p65_p3 = scmp.ne.s32.totalorder %s533_s13, %s529_s12  ;;  %p66_p4 = scmp.eq.s32.totalorder %s586_s16, 0 }
   0xa   : > { %s602_s21 = scalar_select %p50_p1, %s537_s14, %s52_s19  }
   0xb   : > { %p604_p5 = por %p60_p2, %p59_p0  ;;  %p608_p6 = por %p66_p4, %p65_p3 }
   0xc   : > { %p115_p7 = scmp.eq.s32.totalorder %s586_s16, 1  ;;  %p121_p8 = scmp.eq.s32.totalorder %s380_s17, 1 }
   0xd   : > { %p409_p10 = scmp.lt.s32.totalorder %s541_s15, 2  ;;  %s148_s26 = sand.u32 1, %s537_s14  }
   0xe   : > { %p615_p11 = por %p115_p7, %p59_p0  ;;  %p619_p12 = por %p121_p8, %p65_p3 }
   0xf   : > { %s384_s27 = sshll.u32 %s541_s15, 7  ;;  %s383_s28 = sshll.u32 %s148_s26, 3 }
  0x10   : > { %s743_s24 = scalar_select %p615_p11, 1, 0 }
  0x11   : > { %s744_s25 = scalar_select %p619_p12, 1, 0 }
  0x12   : > { %s628_s4 = scalar_lea.hbm %s737_s1, %s384_s27  ;;  %s152_s5 = scalar_lea.vmem [#allocation2], %s383_s28 }
  0x13   : > { %s159_s6 = sshll.u32 %s152_s5, 4  ;;  %p632_p13 = pnand %p409_p10, %p604_p5  ;;  %s636_s6 = int_to_ptr.vmem [resolvable:$true] %s159_s6 }
  0x14   : > { %s149_s8 = scalar_lea.sflag [#allocation3], %s148_s26  ;;  %s445_s9 = scalar_lea.hbm %s628_s4, 128 }
  0x15   : > { %p446_p2 = scmp.ne.s32.totalorder %s628_s4, %s445_s9  ;;  %p447_p3 = pneg %p632_p13 }
  0x16   : > { %s450_s17 = scalar_lea.hbm %s737_s1, 256  ;;  %p451_p5 = scmp.lt.u32.totalorder %s628_s4, %s737_s1 }
  0x17   : > { %p448_p4 = pnand %p447_p3, %p446_p2  ;;  %p452_p8 = scmp.lt.u32.totalorder %s450_s17, %s445_s9 }
  0x18   : > { %p454_p9 = scmp.lt.u32.totalorder %s445_s9, %s628_s4 }
  0x19   : > { %p449_p7 = pneg %p448_p4  ;;  %p453_p10 = por %p452_p8, %p451_p5 }
  0x1b   : > { %p455_p0 = por %p454_p9, %p453_p10 }
  0x1d   : > { %p456_p1 = pnand %p455_p0, %p449_p7 }
  0x1f   : > { %459 = shalt.err (!%p456_p1)
}
  0x20   : > { %s460_s22 = scalar_lea.vmem %s636_s6, 128  ;;  %s543_s26 = smov [#allocation2]  }
  0x21   : > { %p461_p2 = scmp.ne.s32.totalorder %s636_s6, %s460_s22  ;;  %s465_s27 = sshll.u32 %s543_s26, 4  ;;  %s466_s27 = int_to_ptr.vmem [resolvable:$false] %s465_s27 }
  0x22   : > { %s467_s28 = scalar_lea.vmem %s466_s27, 256  ;;  %p468_p11 = scmp.lt.s32.totalorder %s636_s6, %s466_s27 }
  0x23   : > { %p463_p4 = pnand %p461_p2, %p447_p3  ;;  %p469_p5 = scmp.lt.s32.totalorder %s467_s28, %s460_s22 }
  0x25   : > { %p464_p12 = pneg %p463_p4  ;;  %p470_p8 = por %p469_p5, %p468_p11 }
  0x27   : > { %p471_p9 = pnand %p470_p8, %p464_p12 }
  0x29   : > { %474 = shalt.err (!%p471_p9)
}
  0x2a   : > { %404 = dma.hbm_to_vmem [thread:$0]  (!%p632_p13), %s628_s4, 128, %s636_s6, %s149_s8  }
  0x2b   : > { %p746_p0 = scmp.lt.s32.totalorder %s541_s15, 3  ;;  %p747_p1 = scmp.ge.s32.totalorder %s541_s15, 1 }
  0x2d   : > { %p172_p3 = pnand %p747_p1, %p746_p0 }
  0x2e   : > { %s670_s29 = sand.u32 (!%p172_p3), 1, %s533_s13  }
  0x2f   : > { %175 = sbr.rel (%p172_p3) target bundleno = 737 (0x2e1), region = 32  ;;  %s386_s30 = sshll.u32 (!%p172_p3), %s670_s29, 3 }
  0x30   : > { %s178_s5 = scalar_lea.sflag (!%p172_p3), [#allocation3], %s670_s29  ;;  %s181_s9 = scalar_lea.vmem (!%p172_p3), [#allocation2], %s386_s30 }
  0x36   : > { %520 = dma.done.wait (%p608_p6), %s178_s5, 128  }
  0x37   : > { %522 = vsyncadd (%p608_p6), %s178_s5, 4294967168  ;;  %v220_v0 = vld [vmem:[%s181_s9] sm:$0xff]  ;;  %p211_p11 = scmp.lt.s32.totalorder %s586_s16, 1  ;;  %v239_v12 = vlaneseq  ;;  %s389_s10 = sshll.u32 %s586_s16, 3  ;;  %vm247_vm1 = vcmask 7168  }
  0x38   : > { %222 = vadd.xlane.f32.xlu0 %v220_v0  ;;  %v241_v15 = vstv %s389_s10  ;;  %s390_s20 = sshll.u32 %s586_s16, 4  ;;  %s210_s26 = scalar_lea.vmem [#allocation5], %s670_s29 }
  0x39   : > { %s212_s4 = scalar_select %p211_p11, %s586_s16, 1  ;;  %v240_v14 = vshrl.u32 %v239_v12, 7  ;;  %v269_v39 = vand.u32 127, %v239_v12 }
  0x3a   : > { %s290_s27 = sshll.u32 %s210_s26, 4  ;;  %s692_s9 = scalar_lea.hbm %s739_s3, %s390_s20  ;;  %s694_s27 = int_to_ptr.vmem [resolvable:$true] %s290_s27 }
  0x3b   : > { %s387_s6 = sshll.u32 %s212_s4, 3  ;;  %v242_v16 = vadd.s32 %v241_v15, %v240_v14  ;;  %vm271_vm2 = vcmp.eq.s32.totalorder %v269_v39, 1  ;;  %vm270_vm3 = vcmp.eq.s32.totalorder %v269_v39, 0  ;;  %s278_s16 = scalar_lea.sflag [#allocation4], %s670_s29 }
  0x3c   : > { %s214_s8 = scalar_lea.vmem %s736_s0, %s387_s6  ;;  %s218_s19 = scalar_lea.vmem %s738_s2, %s387_s6 }
  0x3d   : > { %v219_v9 = vld [vmem:[%s214_s8] sm:$0xff]  ;;  %vm243_vm0 = vcmp.lt.s32.totalorder %v242_v16, 16  ;;  %s475_s4 = scalar_lea.vmem %s694_s27, 16  ;;  %p748_p12 = scmp.ne.s32.totalorder %s743_s24, 0 }
  0x3e   : > { %v221_v17 = vld [vmem:[%s218_s19] sm:$0xff]  ;;  %p476_p6 = scmp.ne.s32.totalorder %s694_s27, %s475_s4  ;;  %s544_s6 = smov [#allocation5]  }
  0x3f   : > { %v245_v18 = vsel %vm243_vm0, %v221_v17, 0.0  ;;  %s479_s7 = sshll.u32 %s544_s6, 4  ;;  %s480_s7 = int_to_ptr.vmem [resolvable:$false] %s479_s7 }
  0x40   : > { %v258_v19 = vsel %vm247_vm1, %v245_v18, 0.0  ;;  %p477_p13 = pnand %p476_p6, %p748_p12  ;;  %s481_s23 = scalar_lea.vmem %s480_s7, 32 }
  0x41   : > { %p482_p10 = scmp.lt.s32.totalorder %s694_s27, %s480_s7  ;;  %p483_p2 = scmp.lt.s32.totalorder %s481_s23, %s475_s4 }
  0x42   : > { %p478_p7 = pneg %p477_p13 }
  0x43   : > { %p484_p4 = por %p483_p2, %p482_p10 }
  0x45   : > { %p485_p5 = pnand %p484_p4, %p478_p7 }
  0xc5   : > { %v223_v1 = vpop.xlane.xlu0 %222 }
  0xc6   : > { %v224_v2 = vmul.f32 0.0078125, %v223_v1 }
  0xc8   : > { %v225_v3 = vsub.f32 %v220_v0, %v224_v2 }
  0xca   : > { %v226_v4 = vmul.f32 %v225_v3, %v225_v3 }
  0xcc   : > { %227 = vadd.xlane.f32.xlu0 %v226_v4 }
  0xd0   : > { %259 = vadd.xlane.f32.xlu0 %v258_v19 }
 0x159   : > { %v228_v5 = vpop.xlane.xlu0 %227 }
 0x15a   : > { %v229_v6 = vmul.f32 0.007874016, %v228_v5 }
 0x15c   : > { %v230_v7 = vadd.f32 1e-06, %v229_v6 }
 0x15d   : > { %v260_v25 = vpop.xlane.xlu0 %259 }
 0x15e   : > { %443 = vrsqrt.f32 %v230_v7  ;;  %v261_v26 = vrot.slane %v260_v25, 4 }
 0x160   : > { %v262_v27 = vadd.f32 %v261_v26, %v260_v25 }
 0x162   : > { %v263_v28 = vrot.slane %v262_v27, 2 }
 0x164   : > { %v264_v32 = vadd.f32 %v263_v28, %v262_v27 }
 0x166   : > { %v265_v35 = vrot.slane %v264_v32, 1 }
 0x168   : > { %v444_v8 = vpop.eup %443  ;;  %v266_v38 = vadd.f32 %v265_v35, %v264_v32 }
 0x169   : > { %v232_v10 = vmul.f32 %v444_v8, %v225_v3 }
 0x16b   : > { %v233_v11 = vsub.f32 %v219_v9, %v232_v10 }
 0x16d   : > { %v234_v13 = vmul.f32 %v233_v11, %v233_v11 }
 0x16f   : > { %235 = vadd.xlane.f32.xlu1 %v234_v13 }
 0x1fc   : > { %v236_v20 = vpop.xlane.xlu1 %235 }
 0x1fd   : > { %v237_v21 = vmul.f32 0.0078125, %v236_v20 }
 0x1ff   : > { %v244_v22 = vsel %vm243_vm0, %v237_v21, 0.0 }
 0x200   : > { %v246_v23 = vmul.f32 %v245_v18, %v244_v22 }
 0x202   : > { %v248_v24 = vsel %vm247_vm1, %v246_v23, 0.0 }
 0x203   : > { %249 = vadd.xlane.f32.xlu1 %v248_v24 }
 0x290   : > { %v250_v29 = vpop.xlane.xlu1 %249 }
 0x291   : > { %v251_v30 = vrot.slane %v250_v29, 4 }
 0x293   : > { %v252_v31 = vadd.f32 %v251_v30, %v250_v29 }
 0x295   : > { %v253_v33 = vrot.slane %v252_v31, 2 }
 0x297   : > { %v254_v34 = vadd.f32 %v253_v33, %v252_v31 }
 0x299   : > { %v255_v36 = vrot.slane %v254_v34, 1 }
 0x29b   : > { %v256_v37 = vadd.f32 %v255_v36, %v254_v34 }
 0x29d   : > { %393 = vpush %v256_v37 }
 0x29e   : > { %395 = vpush %v266_v38 }
 0x2ce   : > { %s394_s22 = spop %393 }
 0x2cf   : > { %v274_v40 = vstv %s394_s22  ;;  %s396_s28 = spop %395 }
 0x2d0   : > { %v272_v41 = vstv %s396_s28 }
 0x2d1   : > { %v273_v42 = vsel %vm271_vm2, %v272_v41, 0.0 }
 0x2d2   : > { %v275_v43 = vsel %vm270_vm3, %v274_v40, %v273_v42 }
 0x2d3   : > { %276 = vst [vmem:[%s210_s26] sm:$0x1] %v275_v43 }
 0x2d4   : > { %488 = shalt.err (!%p485_p5)
}
 0x2d5   : > { %s489_s29 = scalar_lea.hbm %s692_s9, 16  ;;  %s493_s11 = scalar_lea.hbm %s739_s3, 32 }
 0x2d6   : > { %p490_p8 = scmp.ne.s32.totalorder %s692_s9, %s489_s29  ;;  %p494_p1 = scmp.lt.u32.totalorder %s692_s9, %s739_s3 }
 0x2d7   : > { %p495_p3 = scmp.lt.u32.totalorder %s493_s11, %s489_s29  ;;  %p497_p6 = scmp.lt.u32.totalorder %s489_s29, %s692_s9 }
 0x2d8   : > { %p491_p9 = pnand %p490_p8, %p748_p12 }
 0x2d9   : > { %p496_p11 = por %p495_p3, %p494_p1 }
 0x2da   : > { %p492_p0 = pneg %p491_p9 }
 0x2db   : > { %p498_p13 = por %p497_p6, %p496_p11 }
 0x2dd   : > { %p499_p7 = pnand %p498_p13, %p492_p0 }
 0x2df   : > { %502 = shalt.err (!%p499_p7)
}
 0x2e0   : > { %399 = dma.vmem_to_hbm [thread:$0]  (%p748_p12), %s694_s27, 16, %s692_s9, %s278_s16  }
 0x2e1 PF: > { %s302_s20 = sand.u32 1, %s529_s12   ;;  %p749_p10 = scmp.ne.s32.totalorder %s744_s25, 0 }
 0x2e2   : > { %p750_p2 = scmp.ge.s32.totalorder %s541_s15, 2  ;;  %s303_s22 = scalar_lea.sflag [#allocation4], %s302_s20 }
 0x2e4   : > { %p406_p4 = pnand %p750_p2, %p749_p10 }
 0x2e6   : > { %524 = dma.done.wait (!%p406_p4), %s303_s22, 16  }
 0x2e7   : > { %526 = vsyncadd (!%p406_p4), %s303_s22, 4294967280  ;;  %p16_p5 = scmp.ge.s32.totalorder %s590_s18, 4   ;;  %s751_s12 = smov %s533_s13 }
 0x2e8   : > { %s752_s13 = smov %s537_s14  ;;  %s753_s14 = smov %s602_s21 }
 0x2e9   : > { %s754_s15 = smov %s590_s18  ;;  %18 = sbr.rel (!%p16_p5) target bundleno = 5 (0x5), region = 83 }
 0x2f0   :  { %307 = vsyncpa [#allocation3], 1 }
 0x2f1   :  { %309 = vsyncpa [#allocation3 + $0x1], 1 }
 0x2f2   :  { %310 = vsyncpa [#allocation4], 1 }
 0x2f3   :  { %312 = vsyncpa [#allocation4 + $0x1], 1 }

</bundles_post_ra>
